<compile_context>
chip_gen: v7x
topology: tpu7x:2x2x1
jax: 0.10.0
libtpu: 0.0.40
codegen_flags: <defaults>
</compile_context>

<pallas_src>
import functools

import jax
import jax.numpy as jnp
import numpy as np
from jax import lax
from jax.experimental import pallas as pl
from jax.experimental.pallas import tpu as pltpu


_UNROLL_THRESHOLD = 64            # exact O(D^2) pairwise path up to this D
_BISECT_ITERS = 30                # tau-bisection iterations for D > threshold
_TARGET_BLOCK_ELEMS = 512 * 1024  # ~2 MiB f32 working set per block
_MAX_LANE_TILE = 4096             # lane-tile cap: keeps stores chunky, VMEM bounded


def _min_two_steps(extent, tile, align):
    """Shrink `tile` (kept an `align` multiple) so the grid has >= 2 steps if possible.

    Keeps v7x's second TensorCore busy ("parallel" grid axes shard across cores)
    and gives the DMA pipeline something to overlap on all generations.
    """
    if pl.cdiv(extent, tile) >= 2 or extent <= align:
        return tile
    half = pl.cdiv(pl.cdiv(extent, 2), align) * align
    return max(align, min(tile, half))


def _mosaic_params(block_elems, itemsize, dims):
    """CompilerParams with a scoped-VMEM budget sized to the actual blocks.

    Budget = double-buffered in+out blocks plus ~6 block-sized f32 temporaries.
    Raised above v5e's 16 MiB scoped default; capped below v7x's 64 MiB physical.
    """
    est = int(block_elems) * (4 * itemsize + 6 * 4)
    vmem = int(min(max(est, 32 * 1024 * 1024), 56 * 1024 * 1024))
    return pltpu.CompilerParams(dimension_semantics=dims, vmem_limit_bytes=vmem)


def _cost_estimate(total_elems, d, itemsize):
    """Advisory cost hint so XLA schedules neighbors around the custom call."""
    if d <= _UNROLL_THRESHOLD:
        flops = (5 * d + 8) * total_elems
    else:
        flops = (3 * _BISECT_ITERS + 12) * total_elems
    return pl.CostEstimate(flops=int(flops), transcendentals=0,
                           bytes_accessed=int(2 * total_elems * itemsize))


def _support_stats_pairwise(z, axis):
    """k[i] = #{j : z_j >= z_i},  s[i] = sum_{j : z_j >= z_i} z_j along `axis`.

    Static unroll (D <= _UNROLL_THRESHOLD): accumulators stay SSA values so they
    live in vregs — no per-iteration VMEM round trips.
    """
    d = z.shape[axis]
    k = jnp.zeros_like(z)
    s = jnp.zeros_like(z)
    for j in range(d):
        zj = lax.slice_in_dim(z, j, j + 1, axis=axis)
        ge = zj >= z                                   # bool, no cast + multiply
        k = k + jnp.where(ge, 1.0, 0.0)
        s = s + jnp.where(ge, zj, 0.0)
    return k, s


def _tau_exact_small(z, axis):
    k, s = _support_stats_pairwise(z, axis)
    supp = (1.0 + k * z) > s                           # tie-safe support test
    k_sup = jnp.sum(jnp.where(supp, 1.0, 0.0), axis=axis, keepdims=True)
    s_sup = jnp.sum(jnp.where(supp, z, 0.0), axis=axis, keepdims=True)
    return (s_sup - 1.0) / jnp.maximum(k_sup, 1.0)


def _tau_bisect(z, axis):
    """tau via bisection on f(tau) = sum(max(z - tau, 0)); z is max-normalized.

    max(z) == 0 along `axis`, so f(-1) >= 1 and f(0) = 0 < 1, i.e. tau* in [-1, 0).
    O(D * iters) instead of the O(D^2) pairwise loop — HBM-bound again for large D.
    A final exact pass recovers tau = (sum_support - 1)/|support| (reference formula;
    elements sitting exactly on the boundary cannot change tau).
    """
    red_shape = list(z.shape)
    red_shape[axis] = 1
    lo = jnp.full(red_shape, -1.0, jnp.float32)
    hi = jnp.zeros(red_shape, jnp.float32)

    def body(_, carry):
        lo, hi = carry
        mid = 0.5 * (lo + hi)
        f = jnp.sum(jnp.maximum(z - mid, 0.0), axis=axis, keepdims=True)
        above = f >= 1.0
        return jnp.where(above, mid, lo), jnp.where(above, hi, mid)

    lo, hi = lax.fori_loop(0, _BISECT_ITERS, body, (lo, hi))
    mid = 0.5 * (lo + hi)                    # mid < 0 == max(z)  ->  support nonempty
    supp = z > mid
    k = jnp.maximum(jnp.sum(jnp.where(supp, 1.0, 0.0), axis=axis, keepdims=True), 1.0)
    s = jnp.sum(jnp.where(supp, z, 0.0), axis=axis, keepdims=True)
    return (s - 1.0) / k


def _sparsemax_kernel(x_ref, o_ref, *, axis):
    """Sparsemax along `axis` of the current block; all other axes are independent."""
    z = x_ref[...].astype(jnp.float32)
    z = z - jnp.max(z, axis=axis, keepdims=True)
    d = z.shape[axis]
    tau = _tau_exact_small(z, axis) if d <= _UNROLL_THRESHOLD else _tau_bisect(z, axis)
    o_ref[...] = jnp.maximum(z - tau, 0.0).astype(o_ref.dtype)


def _sparsemax_mid(x3):
    """Sublane-reduce path: x3 = (pre, D, post), sparsemax over the middle axis.

    Lanes stay dense with the contiguous trailing axis; boundary blocks (pre or
    post not tile-aligned) rely on Pallas' masked OOB reads/writes — columns are
    independent, so garbage in OOB regions only produces discarded outputs.
    The reduction dim D is always fully resident in the block.
    """
    pre, d, post = x3.shape
    itemsize = jnp.dtype(x3.dtype).itemsize

    if post <= 128:
        post_tile = post                               # full extent: always layout-legal
    else:
        # 128-multiple lane tile, capped so d * post_tile stays inside the VMEM budget
        # even with pre_tile == 1 (v7x has only 64 MiB physical VMEM).
        lanes_budget = max(128, (_TARGET_BLOCK_ELEMS // max(d, 1)) // 128 * 128)
        post_tile = min(pl.cdiv(post, 128) * 128, lanes_budget, _MAX_LANE_TILE)

    block_per_pre = d * post_tile
    pre_tile = max(1, min(pre, _TARGET_BLOCK_ELEMS // max(block_per_pre, 1)))

    # Keep >= 2 grid steps when possible (v7x dual TC / pipeline overlap).
    if pl.cdiv(pre, pre_tile) * pl.cdiv(post, post_tile) < 2:
        pre_tile = _min_two_steps(pre, pre_tile, 1)
    if pl.cdiv(pre, pre_tile) * pl.cdiv(post, post_tile) < 2:
        post_tile = _min_two_steps(post, post_tile, 128)

    grid = (pl.cdiv(pre, pre_tile), pl.cdiv(post, post_tile))
    block_elems = pre_tile * d * post_tile
    return pl.pallas_call(
        functools.partial(_sparsemax_kernel, axis=1),
        out_shape=jax.ShapeDtypeStruct((pre, d, post), x3.dtype),
        grid=grid,
        in_specs=[pl.BlockSpec((pre_tile, d, post_tile), lambda i, j: (i, 0, j))],
        out_specs=pl.BlockSpec((pre_tile, d, post_tile), lambda i, j: (i, 0, j)),
        compiler_params=_mosaic_params(block_elems, itemsize, ("parallel", "parallel")),
        cost_estimate=_cost_estimate(pre * d * post, d, itemsize),
    )(x3)


def _sparsemax_last(x2):
    """Lane-reduce path: x2 = (N, D), sparsemax over the trailing axis (D >= 128)."""
    n, d = x2.shape
    itemsize = jnp.dtype(x2.dtype).itemsize

    rows_budget = max(8, (_TARGET_BLOCK_ELEMS // max(d, 1)) // 8 * 8)
    row_tile = n if n <= rows_budget else rows_budget
    if pl.cdiv(n, row_tile) < 2:
        row_tile = _min_two_steps(n, row_tile, 8)

    grid = (pl.cdiv(n, row_tile),)
    return pl.pallas_call(
        functools.partial(_sparsemax_kernel, axis=-1),
        out_shape=jax.ShapeDtypeStruct((n, d), x2.dtype),
        grid=grid,
        in_specs=[pl.BlockSpec((row_tile, d), lambda i: (i, 0))],
        out_specs=pl.BlockSpec((row_tile, d), lambda i: (i, 0)),
        compiler_params=_mosaic_params(row_tile * d, itemsize, ("parallel",)),
        cost_estimate=_cost_estimate(n * d, d, itemsize),
    )(x2)


def sparsemax_pallas(x, dim=0):
    """Sparsemax along `dim`, matching SparsemaxFunction.forward semantics."""
    x = jnp.asarray(x)
    ndim = x.ndim
    dim = dim % ndim
    shape = x.shape
    d = int(shape[dim])
    pre = int(np.prod(shape[:dim])) if dim > 0 else 1
    post = int(np.prod(shape[dim + 1:])) if dim + 1 < ndim else 1

    if post > 1:
        # Reduction dim is a middle axis: free (contiguous) reshape, no transpose.
        return _sparsemax_mid(x.reshape(pre, d, post)).reshape(shape)

    # Reduction dim is (effectively) the trailing axis.
    n = pre
    x2 = x.reshape(n, d)
    if d < 128 and n > d:
        # Small trailing D would leave lanes (and stores) mostly masked; a wrapper-side
        # transpose lets the kernel carry `n` densely in lanes instead.
        out_t = _sparsemax_mid(x2.T.reshape(1, d, n))
        return out_t.reshape(d, n).T.reshape(shape)
    return _sparsemax_last(x2).reshape(shape)


class Sparsemax:
    """JAX/Pallas port of the PyTorch Sparsemax nn.Module (forward only)."""
    # TODO(synk): backward pass (SparsemaxFunction.backward) is not implemented here.

    def __init__(self, dim=0):
        self.dim = dim

    def __call__(self, x):
        return sparsemax_pallas(x, dim=self.dim)


def _sparsemax_ref(x, dim=0):
    """Pure-JAX reference mirroring the PyTorch code (sort-based)."""
    x = jnp.asarray(x, jnp.float32)
    z = x - jnp.max(x, axis=dim, keepdims=True)
    z_srt = -jnp.sort(-z, axis=dim)                       # descending sort
    z_cumsum = jnp.cumsum(z_srt, axis=dim) - 1.0
    d = z.shape[dim]
    view = [1] * z.ndim
    view[dim] = d
    rho = jnp.arange(1, d + 1, dtype=z.dtype).reshape(view)
    support = rho * z_srt > z_cumsum
    supp_size = jnp.sum(support, axis=dim, keepdims=True)
    tau = jnp.take_along_axis(z_cumsum, supp_size - 1, axis=dim)
    tau = tau / supp_size.astype(z.dtype)
    return jnp.maximum(z - tau, 0.0)


if __name__ == "__main__":
    key = jax.random.PRNGKey(0)
    k1, k2, k3, k4 = jax.random.split(key, 4)

    # 1) NCHW-style input, sparsemax over channels (dim=1): sublane path, small D.
    x1 = jax.random.normal(k1, (2, 4, 16, 16), dtype=jnp.float32) * 3.0
    o1 = jax.block_until_ready(Sparsemax(dim=1)(x1))
    np.testing.assert_allclose(np.asarray(o1), np.asarray(_sparsemax_ref(x1, 1)),
                               rtol=1e-5, atol=1e-5)
    assert np.all(np.asarray(o1) >= 0.0)
    np.testing.assert_allclose(np.asarray(o1.sum(axis=1)), 1.0, rtol=1e-4, atol=1e-4)

    # 2) Small trailing axis (d=33 < 128): wrapper transpose -> lane-dense sublane path.
    x2 = jax.random.normal(k2, (5, 7, 33), dtype=jnp.float32)
    o2 = jax.block_until_ready(Sparsemax(dim=-1)(x2))
    np.testing.assert_allclose(np.asarray(o2), np.asarray(_sparsemax_ref(x2, 2)),
                               rtol=1e-5, atol=1e-5)

    # 3) Large trailing axis (d=160 > 64): lane-reduce path + tau bisection.
    x3 = jax.random.normal(k3, (4, 8, 160), dtype=jnp.float32) * 2.0
    o3 = jax.block_until_ready(Sparsemax(dim=-1)(x3))
    np.testing.assert_allclose(np.asarray(o3), np.asarray(_sparsemax_ref(x3, 2)),
                               rtol=1e-5, atol=1e-5)

    # 4) Large middle axis (d=96 > 64): sublane path + tau bisection.
    x4 = jax.random.normal(k4, (2, 96, 8, 8), dtype=jnp.float32) * 2.0
    o4 = jax.block_until_ready(Sparsemax(dim=1)(x4))
    np.testing.assert_allclose(np.asarray(o4), np.asarray(_sparsemax_ref(x4, 1)),
                               rtol=1e-5, atol=1e-5)
    np.testing.assert_allclose(np.asarray(o4.sum(axis=1)), 1.0, rtol=1e-4, atol=1e-4)

    print("KERNEL_OK")
</pallas_src>

<mosaic_0001>
module attributes {stable_mosaic.version = 11 : i64} {
  func.func @_sparsemax_kernel(%arg0: i32, %arg1: i32, %arg2: memref<1x4x256xf32, #tpu.memory_space<vmem>>, %arg3: memref<1x4x256xf32, #tpu.memory_space<vmem>>) attributes {dimension_semantics = [#tpu.dimension_semantics<parallel>, #tpu.dimension_semantics<parallel>], iteration_bounds = array<i64: 2, 1>, scalar_prefetch = 0 : i64, scratch_operands = 0 : i64, tpu.core_type = #tpu.core_type<tc>, window_params = [{transform_indices = @transform_0, window_bounds = array<i64: 1, 4, 256>}, {transform_indices = @transform_1, window_bounds = array<i64: 1, 4, 256>}]} {
    %c0 = arith.constant 0 : index
    %c0_0 = arith.constant 0 : index
    %c0_1 = arith.constant 0 : index
    %0 = vector.load %arg2[%c0, %c0_0, %c0_1] : memref<1x4x256xf32, #tpu.memory_space<vmem>>, vector<1x4x256xf32>
    %cst = arith.constant dense<0xFF800000> : vector<1x256xf32>
    %1 = vector.multi_reduction <maximumf>, %0, %cst [1] : vector<1x4x256xf32> to vector<1x256xf32>
    %2 = vector.shape_cast %1 : vector<1x256xf32> to vector<1x1x256xf32>
    %3 = vector.broadcast %2 : vector<1x1x256xf32> to vector<1x4x256xf32>
    %4 = arith.subf %0, %3 : vector<1x4x256xf32>
    %cst_2 = arith.constant 0.000000e+00 : f32
    %5 = vector.broadcast %cst_2 : f32 to vector<1x4x256xf32>
    %cst_3 = arith.constant 0.000000e+00 : f32
    %6 = vector.broadcast %cst_3 : f32 to vector<1x4x256xf32>
    %7 = vector.extract_strided_slice %4 {offsets = [0, 0, 0], sizes = [1, 1, 256], strides = [1, 1, 1]} : vector<1x4x256xf32> to vector<1x1x256xf32>
    %8 = vector.broadcast %7 : vector<1x1x256xf32> to vector<1x4x256xf32>
    %9 = arith.cmpf oge, %8, %4 : vector<1x4x256xf32>
    %cst_4 = arith.constant 1.000000e+00 : f32
    %cst_5 = arith.constant 0.000000e+00 : f32
    %10 = vector.broadcast %cst_4 : f32 to vector<1x4x256xf32>
    %11 = vector.broadcast %cst_5 : f32 to vector<1x4x256xf32>
    %12 = arith.select %9, %10, %11 : vector<1x4x256xi1>, vector<1x4x256xf32>
    %13 = arith.addf %5, %12 : vector<1x4x256xf32>
    %cst_6 = arith.constant 0.000000e+00 : f32
    %14 = vector.shape_cast %7 : vector<1x1x256xf32> to vector<1x1x256xf32>
    %15 = vector.broadcast %14 : vector<1x1x256xf32> to vector<1x4x256xf32>
    %16 = vector.broadcast %cst_6 : f32 to vector<1x4x256xf32>
    %17 = arith.select %9, %15, %16 : vector<1x4x256xi1>, vector<1x4x256xf32>
    %18 = arith.addf %6, %17 : vector<1x4x256xf32>
    %19 = vector.extract_strided_slice %4 {offsets = [0, 1, 0], sizes = [1, 1, 256], strides = [1, 1, 1]} : vector<1x4x256xf32> to vector<1x1x256xf32>
    %20 = vector.broadcast %19 : vector<1x1x256xf32> to vector<1x4x256xf32>
    %21 = arith.cmpf oge, %20, %4 : vector<1x4x256xf32>
    %cst_7 = arith.constant 1.000000e+00 : f32
    %cst_8 = arith.constant 0.000000e+00 : f32
    %22 = vector.broadcast %cst_7 : f32 to vector<1x4x256xf32>
    %23 = vector.broadcast %cst_8 : f32 to vector<1x4x256xf32>
    %24 = arith.select %21, %22, %23 : vector<1x4x256xi1>, vector<1x4x256xf32>
    %25 = arith.addf %13, %24 : vector<1x4x256xf32>
    %cst_9 = arith.constant 0.000000e+00 : f32
    %26 = vector.shape_cast %19 : vector<1x1x256xf32> to vector<1x1x256xf32>
    %27 = vector.broadcast %26 : vector<1x1x256xf32> to vector<1x4x256xf32>
    %28 = vector.broadcast %cst_9 : f32 to vector<1x4x256xf32>
    %29 = arith.select %21, %27, %28 : vector<1x4x256xi1>, vector<1x4x256xf32>
    %30 = arith.addf %18, %29 : vector<1x4x256xf32>
    %31 = vector.extract_strided_slice %4 {offsets = [0, 2, 0], sizes = [1, 1, 256], strides = [1, 1, 1]} : vector<1x4x256xf32> to vector<1x1x256xf32>
    %32 = vector.broadcast %31 : vector<1x1x256xf32> to vector<1x4x256xf32>
    %33 = arith.cmpf oge, %32, %4 : vector<1x4x256xf32>
    %cst_10 = arith.constant 1.000000e+00 : f32
    %cst_11 = arith.constant 0.000000e+00 : f32
    %34 = vector.broadcast %cst_10 : f32 to vector<1x4x256xf32>
    %35 = vector.broadcast %cst_11 : f32 to vector<1x4x256xf32>
    %36 = arith.select %33, %34, %35 : vector<1x4x256xi1>, vector<1x4x256xf32>
    %37 = arith.addf %25, %36 : vector<1x4x256xf32>
    %cst_12 = arith.constant 0.000000e+00 : f32
    %38 = vector.shape_cast %31 : vector<1x1x256xf32> to vector<1x1x256xf32>
    %39 = vector.broadcast %38 : vector<1x1x256xf32> to vector<1x4x256xf32>
    %40 = vector.broadcast %cst_12 : f32 to vector<1x4x256xf32>
    %41 = arith.select %33, %39, %40 : vector<1x4x256xi1>, vector<1x4x256xf32>
    %42 = arith.addf %30, %41 : vector<1x4x256xf32>
    %43 = vector.extract_strided_slice %4 {offsets = [0, 3, 0], sizes = [1, 1, 256], strides = [1, 1, 1]} : vector<1x4x256xf32> to vector<1x1x256xf32>
    %44 = vector.broadcast %43 : vector<1x1x256xf32> to vector<1x4x256xf32>
    %45 = arith.cmpf oge, %44, %4 : vector<1x4x256xf32>
    %cst_13 = arith.constant 1.000000e+00 : f32
    %cst_14 = arith.constant 0.000000e+00 : f32
    %46 = vector.broadcast %cst_13 : f32 to vector<1x4x256xf32>
    %47 = vector.broadcast %cst_14 : f32 to vector<1x4x256xf32>
    %48 = arith.select %45, %46, %47 : vector<1x4x256xi1>, vector<1x4x256xf32>
    %49 = arith.addf %37, %48 : vector<1x4x256xf32>
    %cst_15 = arith.constant 0.000000e+00 : f32
    %50 = vector.shape_cast %43 : vector<1x1x256xf32> to vector<1x1x256xf32>
    %51 = vector.broadcast %50 : vector<1x1x256xf32> to vector<1x4x256xf32>
    %52 = vector.broadcast %cst_15 : f32 to vector<1x4x256xf32>
    %53 = arith.select %45, %51, %52 : vector<1x4x256xi1>, vector<1x4x256xf32>
    %54 = arith.addf %42, %53 : vector<1x4x256xf32>
    %55 = arith.mulf %49, %4 : vector<1x4x256xf32>
    %cst_16 = arith.constant 1.000000e+00 : f32
    %56 = vector.broadcast %cst_16 : f32 to vector<1x4x256xf32>
    %57 = arith.addf %56, %55 : vector<1x4x256xf32>
    %58 = arith.cmpf ogt, %57, %54 : vector<1x4x256xf32>
    %cst_17 = arith.constant 1.000000e+00 : f32
    %cst_18 = arith.constant 0.000000e+00 : f32
    %59 = vector.broadcast %cst_17 : f32 to vector<1x4x256xf32>
    %60 = vector.broadcast %cst_18 : f32 to vector<1x4x256xf32>
    %61 = arith.select %58, %59, %60 : vector<1x4x256xi1>, vector<1x4x256xf32>
    %cst_19 = arith.constant dense<0.000000e+00> : vector<1x256xf32>
    %62 = vector.multi_reduction <add>, %61, %cst_19 [1] : vector<1x4x256xf32> to vector<1x256xf32>
    %63 = vector.shape_cast %62 : vector<1x256xf32> to vector<1x1x256xf32>
    %cst_20 = arith.constant 0.000000e+00 : f32
    %64 = vector.broadcast %cst_20 : f32 to vector<1x4x256xf32>
    %65 = arith.select %58, %4, %64 : vector<1x4x256xi1>, vector<1x4x256xf32>
    %cst_21 = arith.constant dense<0.000000e+00> : vector<1x256xf32>
    %66 = vector.multi_reduction <add>, %65, %cst_21 [1] : vector<1x4x256xf32> to vector<1x256xf32>
    %67 = vector.shape_cast %66 : vector<1x256xf32> to vector<1x1x256xf32>
    %cst_22 = arith.constant 1.000000e+00 : f32
    %68 = vector.broadcast %cst_22 : f32 to vector<1x1x256xf32>
    %69 = arith.subf %67, %68 : vector<1x1x256xf32>
    %cst_23 = arith.constant 1.000000e+00 : f32
    %70 = vector.broadcast %cst_23 : f32 to vector<1x1x256xf32>
    %71 = arith.maximumf %63, %70 : vector<1x1x256xf32>
    %72 = arith.divf %69, %71 : vector<1x1x256xf32>
    %73 = vector.broadcast %72 : vector<1x1x256xf32> to vector<1x4x256xf32>
    %74 = arith.subf %4, %73 : vector<1x4x256xf32>
    %cst_24 = arith.constant 0.000000e+00 : f32
    %75 = vector.broadcast %cst_24 : f32 to vector<1x4x256xf32>
    %76 = arith.maximumf %74, %75 : vector<1x4x256xf32>
    %c0_25 = arith.constant 0 : index
    %c0_26 = arith.constant 0 : index
    %c0_27 = arith.constant 0 : index
    %77 = vector.load %arg3[%c0_25, %c0_26, %c0_27] : memref<1x4x256xf32, #tpu.memory_space<vmem>>, vector<1x4x256xf32>
    tpu.vector_store %arg3[%c0_25, %c0_26, %c0_27], %76 {strides = array<i32>} : memref<1x4x256xf32, #tpu.memory_space<vmem>>, vector<1x4x256xf32>,
    return
  }
  func.func @transform_0(%arg0: i32, %arg1: i32) -> (i32, i32, i32) {
    %c0_i32 = arith.constant 0 : i32
    %c0_i32_0 = arith.constant 0 : i32
    return %arg0, %c0_i32, %arg1 : i32, i32, i32
  }
  func.func @transform_1(%arg0: i32, %arg1: i32) -> (i32, i32, i32) {
    %c0_i32 = arith.constant 0 : i32
    %c0_i32_0 = arith.constant 0 : i32
    return %arg0, %c0_i32, %arg1 : i32, i32, i32
  }
}

</mosaic_0001>

<bundles_post_ra>
// kernel: tpu_custom_call.1
= control target key start
LH: loop header
LB: loop body
LE: loop exit
PB: predicated region body
PF: predicated region fallthrough
CT: control target
= control target key end

     0   :  { %6 = vsyncpa [#allocation3], 0  ;;  %s861_s0 = inlined_call_operand.hbm [shape: f32[2,4,256], index: 0, kind: input, shape index: {}]   ;;  %s862_s1 = inlined_call_operand.hbm [shape: f32[2,4,256], index: 1, kind: output, shape index: {}]  }
   0x1   :  { %8 = vsyncpa [#allocation3 + $0x1], 0 }
   0x2   :  { %9 = vsyncpa [#allocation4], 0 }
   0x3   :  { %11 = vsyncpa [#allocation4 + $0x1], 0  ;;  %s660_s6 = smov 0   ;;  %s662_s7 = smov 0  }
   0x4   :  { %s664_s8 = smov 0   ;;  %s666_s9 = smov 0  }
   0x5   :  { %s668_s10 = smov 0   ;;  %s670_s11 = smov 0  }
   0x6 LB: > { %s446_s12 = sadd.s32 4294967295, %s645_s11   ;;  %s447_s13 = sadd.s32 4294967294, %s645_s11   ;;  %s645_s11 = sphi %s670_s11, %s17_s11   ;;  %s641_s10 = sphi %s668_s10, %s878_s10   ;;  %s637_s9 = sphi %s666_s9, %s877_s9   ;;  %s633_s8 = sphi %s664_s8, %s876_s8   ;;  %s629_s7 = sphi %s662_s7, %s875_s7   ;;  %s625_s6 = sphi %s660_s6, %s874_s6  }
   0x7   : > { %s29_s14 = sadd.s32 1, %s641_s10  ;;  %s38_s15 = sadd.s32 1, %s633_s8 }
   0x8   : > { %p31_p0 = scmp.ge.s32.totalorder %s29_s14, 2  ;;  %p45_p1 = scmp.ne.s32.totalorder %s633_s8, %s629_s7 }
   0x9   : > { %p46_p2 = scmp.eq.s32.totalorder %s645_s11, 0  ;;  %p51_p3 = scmp.ne.s32.totalorder %s629_s7, %s625_s6 }
   0xa   : > { %s880_s14 = smov (%p31_p0, %s29_s14), 0  ;;  %p52_p5 = scmp.eq.s32.totalorder %s446_s12, 0 }
   0xb   : > { %p701_p4 = por %p46_p2, %p45_p1  ;;  %s33_s17 = ssub.s32 %s641_s10, %s880_s14 }
   0xc   : > { %p77_p6 = scmp.eq.s32.totalorder %s446_s12, 1  ;;  %p36_p7 = scmp.eq.s32.totalorder %s33_s17, 0 }
   0xd   : > { %p707_p8 = por %p52_p5, %p51_p3  ;;  %p83_p10 = scmp.eq.s32.totalorder %s447_s13, 1 }
   0xe   : > { %p711_p9 = por %p77_p6, %p45_p1  ;;  %p477_p13 = scmp.lt.s32.totalorder %s645_s11, 2 }
   0xf   : > { %s716_s20 = scalar_select %p36_p7, %s633_s8, %s38_s15  }
  0x10   : > { %s866_s19 = scalar_select %p711_p9, 1, 0 }
  0x11   : > { %p718_p11 = por %p83_p10, %p51_p3  ;;  %s103_s22 = sand.u32 1, %s633_s8  }
  0x12   : > { %s450_s23 = sshll.u32 %s103_s22, 3  ;;  %s463_s24 = sshll.u32 %s641_s10, 7 }
  0x13   : > { %s867_s21 = scalar_select %p718_p11, 1, 0 }
  0x14   : > { %s729_s27 = scalar_lea.hbm %s861_s0, %s463_s24  ;;  %s107_s28 = scalar_lea.vmem [#allocation2], %s450_s23 }
  0x15   : > { %s117_s29 = sshll.u32 %s107_s28, 4  ;;  %p735_p0 = pnand %p477_p13, %p701_p4  ;;  %s731_s29 = int_to_ptr.vmem [resolvable:$true] %s117_s29 }
  0x16   : > { %s104_s2 = scalar_lea.sflag [#allocation3], %s103_s22  ;;  %s533_s3 = scalar_lea.hbm %s729_s27, 128 }
  0x17   : > { %p534_p3 = scmp.ne.s32.totalorder %s729_s27, %s533_s3  ;;  %p535_p5 = pneg %p735_p0 }
  0x18   : > { %s538_s12 = scalar_lea.hbm %s861_s0, 256  ;;  %p539_p4 = scmp.lt.u32.totalorder %s729_s27, %s861_s0 }
  0x19   : > { %p536_p6 = pnand %p535_p5, %p534_p3  ;;  %p540_p10 = scmp.lt.u32.totalorder %s538_s12, %s533_s3 }
  0x1a   : > { %p542_p12 = scmp.lt.u32.totalorder %s533_s3, %s729_s27 }
  0x1b   : > { %p537_p7 = pneg %p536_p6  ;;  %p541_p13 = por %p540_p10, %p539_p4 }
  0x1d   : > { %p543_p1 = por %p542_p12, %p541_p13 }
  0x1f   : > { %p544_p2 = pnand %p543_p1, %p537_p7 }
  0x21   : > { %547 = shalt.err (!%p544_p2)
}
  0x22   : > { %s548_s16 = scalar_lea.vmem %s731_s29, 128  ;;  %s647_s17 = smov [#allocation2]  }
  0x23   : > { %p549_p3 = scmp.ne.s32.totalorder %s731_s29, %s548_s16  ;;  %s553_s22 = sshll.u32 %s647_s17, 4  ;;  %s554_s22 = int_to_ptr.vmem [resolvable:$false] %s553_s22 }
  0x24   : > { %s555_s23 = scalar_lea.vmem %s554_s22, 256  ;;  %p556_p9 = scmp.lt.s32.totalorder %s731_s29, %s554_s22 }
  0x25   : > { %p551_p6 = pnand %p549_p3, %p535_p5  ;;  %p557_p4 = scmp.lt.s32.totalorder %s555_s23, %s548_s16 }
  0x27   : > { %p552_p11 = pneg %p551_p6  ;;  %p558_p10 = por %p557_p4, %p556_p9 }
  0x29   : > { %p559_p12 = pnand %p558_p10, %p552_p11 }
  0x2b   : > { %562 = shalt.err (!%p559_p12)
}
  0x2c   : > { %472 = dma.hbm_to_vmem [thread:$0]  (!%p735_p0), %s729_s27, 128, %s731_s29, %s104_s2  }
  0x2d   : > { %p869_p1 = scmp.lt.s32.totalorder %s645_s11, 3  ;;  %p870_p2 = scmp.ge.s32.totalorder %s645_s11, 1 }
  0x2f   : > { %p123_p5 = pnand %p870_p2, %p869_p1 }
  0x30   : > { %s771_s24 = sand.u32 (!%p123_p5), 1, %s629_s7  }
  0x31   : > { %126 = sbr.rel (%p123_p5) target bundleno = 146 (0x92), region = 24  ;;  %s454_s25 = sshll.u32 (!%p123_p5), %s771_s24, 3 }
  0x32   : > { %s129_s26 = scalar_lea.sflag (!%p123_p5), [#allocation3], %s771_s24  ;;  %s132_s28 = scalar_lea.vmem (!%p123_p5), [#allocation2], %s454_s25 }
  0x38   : > { %616 = dma.done.wait (%p707_p8), %s129_s26, 128  }
  0x39   : > { %618 = vsyncadd (%p707_p8), %s129_s26, 4294967168  ;;  %vm157_vm0 = vcmask 1043456   ;;  %v153_v0 = vld [vmem:[%s132_s28] sm:$0xff]  ;;  %v178_v11 = vlaneseq  ;;  %v648_v45 = vmov 0.0   ;;  %s150_s18 = scalar_lea.vmem [#allocation5], %s454_s25  ;;  %s464_s29 = sshll.u32 %s637_s9, 7 }
  0x3a   : > { %v155_v1 = vcombine.high %v153_v0, %v153_v0  ;;  %v158_v2 = vsel %vm157_vm0, %v153_v0, -inf  ;;  %s362_s27 = sshll.u32 %s150_s18, 4  ;;  %s814_s3 = scalar_lea.hbm %s862_s1, %s464_s29  ;;  %s809_s27 = int_to_ptr.vmem [resolvable:$true] %s362_s27 }
  0x3b   : > { %v159_v3 = vrot.slane %v158_v2, 4  ;;  %v179_v16 = vshrl.u32 %v178_v11, 7  ;;  %s346_s4 = scalar_lea.sflag [#allocation4], %s771_s24  ;;  %s563_s5 = scalar_lea.vmem %s809_s27, 128 }
  0x3c   : > { %v165_v4 = vsel %vm157_vm0, %v155_v1, -inf  ;;  %p564_p8 = scmp.ne.s32.totalorder %s809_s27, %s563_s5  ;;  %p871_p9 = scmp.ne.s32.totalorder %s866_s19, 0 }
  0x3d   : > { %v160_v5 = vmax.f32 %v158_v2, %v159_v3  ;;  %v166_v6 = vrot.slane %v165_v4, 4  ;;  %v180_v19 = vsub.s32 0, %v179_v16  ;;  %v184_v20 = vsub.s32 4, %v179_v16  ;;  %s649_s9 = smov [#allocation5]  }
  0x3e   : > { %v210_v21 = vsub.s32 1, %v179_v16  ;;  %v214_v22 = vsub.s32 5, %v179_v16  ;;  %v238_v23 = vsub.s32 2, %v179_v16  ;;  %v242_v24 = vsub.s32 6, %v179_v16  ;;  %p565_p11 = pnand %p564_p8, %p871_p9  ;;  %s567_s12 = sshll.u32 %s649_s9, 4  ;;  %s568_s12 = int_to_ptr.vmem [resolvable:$false] %s567_s12 }
  0x3f   : > { %v161_v7 = vrot.slane %v160_v5, 2  ;;  %v167_v8 = vmax.f32 %v165_v4, %v166_v6  ;;  %v266_v25 = vsub.s32 3, %v179_v16  ;;  %v270_v27 = vsub.s32 7, %v179_v16  ;;  %s569_s13 = scalar_lea.vmem %s568_s12, 256  ;;  %p570_p7 = scmp.lt.s32.totalorder %s809_s27, %s568_s12 }
  0x40   : > { %p566_p0 = pneg %p565_p11  ;;  %p571_p13 = scmp.lt.s32.totalorder %s569_s13, %s563_s5 }
  0x41   : > { %v162_v9 = vmax.f32 %v160_v5, %v161_v7  ;;  %v168_v10 = vrot.slane %v167_v8, 2 }
  0x42   : > { %p572_p3 = por %p571_p13, %p570_p7 }
  0x43   : > { %v163_v12 = vrot.slane %v162_v9, 1  ;;  %v169_v13 = vmax.f32 %v167_v8, %v168_v10 }
  0x44   : > { %p573_p6 = pnand %p572_p3, %p566_p0 }
  0x45   : > { %v164_v14 = vmax.f32 %v162_v9, %v163_v12  ;;  %v170_v15 = vrot.slane %v169_v13, 1 }
  0x47   : > { %v171_v17 = vmax.f32 %v169_v13, %v170_v15 }
  0x49   : > { %v174_v18 = vcombine.low %v164_v14, %v171_v17 }
  0x4b   : > { %v783_v26 = vsub.f32 %v153_v0, %v174_v18 }
  0x4d   : > { %v181_v28 = vrot.slane %v783_v26, %v180_v19  ;;  %v185_v29 = vrot.slane %v783_v26, %v184_v20  ;;  %v196_v30 = vcombine.high %v783_v26, %v783_v26  ;;  %v211_v31 = vrot.slane %v783_v26, %v210_v21 }
  0x4e   : > { %v215_v32 = vrot.slane %v783_v26, %v214_v22  ;;  %v239_v33 = vrot.slane %v783_v26, %v238_v23  ;;  %v243_v34 = vrot.slane %v783_v26, %v242_v24  ;;  %v267_v35 = vrot.slane %v783_v26, %v266_v25 }
  0x4f   : > { %v191_v36 = vrot.slane %v181_v28, %v180_v19  ;;  %v195_v37 = vrot.slane %v185_v29, %v180_v19  ;;  %v221_v38 = vrot.slane %v211_v31, %v210_v21  ;;  %v271_v39 = vrot.slane %v783_v26, %v270_v27 }
  0x50   : > { %v225_v40 = vrot.slane %v215_v32, %v210_v21  ;;  %v249_v41 = vrot.slane %v239_v33, %v238_v23  ;;  %v253_v42 = vrot.slane %v243_v34, %v238_v23  ;;  %v277_v43 = vrot.slane %v267_v35, %v266_v25 }
  0x51   : > { %vm198_vm1 = vcmp.ge.f32.partialorder %v191_v36, %v783_v26  ;;  %vm199_vm2 = vcmp.ge.f32.partialorder %v195_v37, %v196_v30  ;;  %vm226_vm3 = vcmp.ge.f32.partialorder %v221_v38, %v783_v26  ;;  %v281_v44 = vrot.slane %v271_v39, %v266_v25 }
  0x52   : > { %v200_v46 = vsel %vm198_vm1, 1.0, %v648_v45  ;;  %v201_v47 = vsel %vm199_vm2, 1.0, %v648_v45  ;;  %v204_v48 = vsel %vm198_vm1, %v191_v36, 0.0  ;;  %v205_v49 = vsel %vm199_vm2, %v195_v37, 0.0 }
  0x53   : > { %vm227_vm4 = vcmp.ge.f32.partialorder %v225_v40, %v196_v30  ;;  %v228_v50 = vsel %vm226_vm3, 1.0, %v648_v45  ;;  %v232_v51 = vsel %vm226_vm3, %v221_v38, 0.0  ;;  %vm254_vm5 = vcmp.ge.f32.partialorder %v249_v41, %v783_v26 }
  0x54   : > { %v229_v52 = vsel %vm227_vm4, 1.0, %v648_v45  ;;  %v230_v53 = vadd.f32 %v228_v50, %v200_v46  ;;  %v233_v54 = vsel %vm227_vm4, %v225_v40, 0.0  ;;  %v234_v55 = vadd.f32 %v232_v51, %v204_v48 }
  0x55   : > { %v231_v56 = vadd.f32 %v229_v52, %v201_v47  ;;  %v235_v57 = vadd.f32 %v233_v54, %v205_v49  ;;  %vm255_vm6 = vcmp.ge.f32.partialorder %v253_v42, %v196_v30  ;;  %v256_v58 = vsel %vm254_vm5, 1.0, %v648_v45 }
  0x56   : > { %v257_v59 = vsel %vm255_vm6, 1.0, %v648_v45  ;;  %v258_v60 = vadd.f32 %v256_v58, %v230_v53  ;;  %v260_v61 = vsel %vm254_vm5, %v249_v41, 0.0  ;;  %v261_v62 = vsel %vm255_vm6, %v253_v42, 0.0 }
  0x57   : > { %v259_v63 = vadd.f32 %v257_v59, %v231_v56  ;;  %v262_v0 = vadd.f32 %v260_v61, %v234_v55  ;;  %vm282_vm7 = vcmp.ge.f32.partialorder %v277_v43, %v783_v26  ;;  %v263_v1 = vadd.f32 %v261_v62, %v235_v57 }
  0x58   : > { %vm283_vm8 = vcmp.ge.f32.partialorder %v281_v44, %v196_v30  ;;  %v284_v2 = vsel %vm282_vm7, 1.0, %v648_v45  ;;  %v288_v3 = vsel %vm282_vm7, %v277_v43, 0.0 }
  0x59   : > { %v285_v4 = vsel %vm283_vm8, 1.0, %v648_v45  ;;  %v286_v5 = vadd.f32 %v284_v2, %v258_v60  ;;  %v289_v6 = vsel %vm283_vm8, %v281_v44, 0.0  ;;  %v290_v8 = vadd.f32 %v288_v3, %v262_v0 }
  0x5a   : > { %v287_v7 = vadd.f32 %v285_v4, %v259_v63  ;;  %v291_v10 = vadd.f32 %v289_v6, %v263_v1 }
  0x5b   : > { %v292_v9 = vmul.f32 %v286_v5, %v783_v26 }
  0x5c   : > { %v293_v11 = vmul.f32 %v287_v7, %v196_v30 }
  0x5d   : > { %v294_v12 = vadd.f32 1.0, %v292_v9 }
  0x5e   : > { %v295_v13 = vadd.f32 1.0, %v293_v11 }
  0x5f   : > { %vm296_vm9 = vcmp.gt.f32.partialorder %v294_v12, %v290_v8 }
  0x60   : > { %vm297_vm10 = vcmp.gt.f32.partialorder %v295_v13, %v291_v10  ;;  %v298_v14 = vsel %vm296_vm9, 1.0, %v648_v45  ;;  %v314_v15 = vsel %vm296_vm9, %v783_v26, 0.0 }
  0x61   : > { %v299_v16 = vsel %vm297_vm10, 1.0, %v648_v45  ;;  %v300_v17 = vsel %vm157_vm0, %v298_v14, 0.0  ;;  %v315_v18 = vsel %vm297_vm10, %v196_v30, 0.0  ;;  %v316_v19 = vsel %vm157_vm0, %v314_v15, 0.0 }
  0x62   : > { %v301_v20 = vrot.slane %v300_v17, 4  ;;  %v307_v21 = vsel %vm157_vm0, %v299_v16, 0.0  ;;  %v317_v22 = vrot.slane %v316_v19, 4  ;;  %v323_v23 = vsel %vm157_vm0, %v315_v18, 0.0 }
  0x63   : > { %v308_v24 = vrot.slane %v307_v21, 4  ;;  %v324_v25 = vrot.slane %v323_v23, 4 }
  0x64   : > { %v302_v27 = vadd.f32 %v301_v20, %v300_v17  ;;  %v318_v28 = vadd.f32 %v317_v22, %v316_v19 }
  0x65   : > { %v309_v29 = vadd.f32 %v308_v24, %v307_v21  ;;  %v325_v31 = vadd.f32 %v324_v25, %v323_v23 }
  0x66   : > { %v303_v32 = vrot.slane %v302_v27, 2  ;;  %v319_v34 = vrot.slane %v318_v28, 2 }
  0x67   : > { %v310_v33 = vrot.slane %v309_v29, 2  ;;  %v326_v36 = vrot.slane %v325_v31, 2 }
  0x68   : > { %v304_v35 = vadd.f32 %v303_v32, %v302_v27  ;;  %v320_v39 = vadd.f32 %v319_v34, %v318_v28 }
  0x69   : > { %v311_v30 = vadd.f32 %v310_v33, %v309_v29  ;;  %v327_v41 = vadd.f32 %v326_v36, %v325_v31 }
  0x6a   : > { %v305_v37 = vrot.slane %v304_v35, 1  ;;  %v321_v44 = vrot.slane %v320_v39, 1 }
  0x6b   : > { %v312_v38 = vrot.slane %v311_v30, 1  ;;  %v328_v46 = vrot.slane %v327_v41, 1 }
  0x6c   : > { %v306_v40 = vadd.f32 %v305_v37, %v304_v35  ;;  %v322_v47 = vadd.f32 %v321_v44, %v320_v39 }
  0x6d   : > { %v313_v42 = vadd.f32 %v312_v38, %v311_v30  ;;  %v329_v48 = vadd.f32 %v328_v46, %v327_v41 }
  0x6e   : > { %v332_v43 = vmax.f32 %v306_v40, 1.0  ;;  %v456_v49 = vadd.f32 -1.0, %v322_v47 }
  0x6f   : > { %v333_v45 = vmax.f32 %v313_v42, 1.0  ;;  %v457_v50 = vadd.f32 -1.0, %v329_v48 }
  0x70   : > { %529 = vrcp.f32 %v332_v43 }
  0x71   : > { %531 = vrcp.f32 %v333_v45 }
  0x7a   : > { %v530_v51 = vpop.eup %529 }
  0x7b   : > { %v532_v52 = vpop.eup %531  ;;  %v335_v53 = vmul.f32 %v530_v51, %v456_v49 }
  0x7c   : > { %v337_v54 = vmul.f32 %v532_v52, %v457_v50 }
  0x7e   : > { %v340_v55 = vcombine.low %v335_v53, %v337_v54 }
  0x80   : > { %v342_v56 = vsub.f32 %v783_v26, %v340_v55 }
  0x82   : > { %v343_v57 = vmax.f32 %v342_v56, 0.0 }
  0x84   : > { %344 = vst [vmem:[%s150_s18] sm:$0xff] %v343_v57 }
  0x85   : > { %576 = shalt.err (!%p573_p6)
}
  0x86   : > { %s577_s15 = scalar_lea.hbm %s814_s3, 128  ;;  %s581_s22 = scalar_lea.hbm %s862_s1, 256 }
  0x87   : > { %p578_p4 = scmp.ne.s32.totalorder %s814_s3, %s577_s15  ;;  %p582_p1 = scmp.lt.u32.totalorder %s814_s3, %s862_s1 }
  0x88   : > { %p583_p2 = scmp.lt.u32.totalorder %s581_s22, %s577_s15  ;;  %p585_p8 = scmp.lt.u32.totalorder %s577_s15, %s814_s3 }
  0x89   : > { %p579_p10 = pnand %p578_p4, %p871_p9 }
  0x8a   : > { %p584_p5 = por %p583_p2, %p582_p1 }
  0x8b   : > { %p580_p12 = pneg %p579_p10 }
  0x8c   : > { %p586_p11 = por %p585_p8, %p584_p5 }
  0x8e   : > { %p587_p0 = pnand %p586_p11, %p580_p12 }
  0x90   : > { %590 = shalt.err (!%p587_p0)
}
  0x91   : > { %467 = dma.vmem_to_hbm [thread:$0]  (%p871_p9), %s809_s27, 128, %s814_s3, %s346_s4  }
  0x92 PF: > { %s374_s25 = sand.u32 1, %s625_s6   ;;  %p872_p7 = scmp.ne.s32.totalorder %s867_s21, 0 }
  0x93   : > { %p873_p13 = scmp.ge.s32.totalorder %s645_s11, 2  ;;  %s375_s26 = scalar_lea.sflag [#allocation4], %s374_s25 }
  0x95   : > { %p474_p3 = pnand %p873_p13, %p872_p7 }
  0x97   : > { %620 = dma.done.wait (!%p474_p3), %s375_s26, 128  }
  0x98   : > { %622 = vsyncadd (!%p474_p3), %s375_s26, 4294967168  ;;  %s17_s11 = sadd.s32 1, %s645_s11   ;;  %s874_s6 = smov %s629_s7 }
  0x99   : > { %p14_p6 = scmp.ge.s32.totalorder %s17_s11, 4   ;;  %s875_s7 = smov %s633_s8 }
  0x9a   : > { %s876_s8 = smov %s716_s20  ;;  %s877_s9 = smov %s641_s10 }
  0x9b   : > { %s878_s10 = smov %s880_s14  ;;  %16 = sbr.rel (!%p14_p6) target bundleno = 6 (0x6), region = 69 }
  0xa2   :  { %380 = vsyncpa [#allocation3], 1 }
  0xa3   :  { %382 = vsyncpa [#allocation3 + $0x1], 1 }
  0xa4   :  { %383 = vsyncpa [#allocation4], 1 }
  0xa5   :  { %385 = vsyncpa [#allocation4 + $0x1], 1 }

</bundles_post_ra>
